<compile_context>
chip_gen: v5e
topology: v5e:2x2
jax: 0.10.0
libtpu: 0.0.40
codegen_flags: <defaults>
</compile_context>

<pallas_src>
import jax
import jax.numpy as jnp
from jax import lax
from jax.experimental import pallas as pl
from jax.experimental.pallas import tpu as pltpu


LANE = 128


def _round_up(x, m):
    return (x + m - 1) // m * m


def _pad2d(x, rows, cols):
    r, c = x.shape
    return jnp.pad(x, ((0, rows - r), (0, cols - c)))


# ----------------------------------------------------------------------------
# Kernel A: context stub + post_emb (fused)
#   roi -> obj_dists ;  tanh(roi @ Wctx) -> edge_ctx -> head_rep / tail_rep
# ----------------------------------------------------------------------------
def _context_kernel(roi_ref, wobj_ref, bobj_ref, wctx_ref, bctx_ref,
                    wpeh_ref, bpeh_ref, wpet_ref, bpet_ref,
                    obj_dists_ref, head_ref, tail_ref):
    roi = roi_ref[...]                                               # bf16 [Np, Cp]
    obj_dists_ref[...] = (
        jnp.dot(roi, wobj_ref[...], preferred_element_type=jnp.float32)
        + bobj_ref[...])
    ec = jnp.tanh(
        jnp.dot(roi, wctx_ref[...], preferred_element_type=jnp.float32)
        + bctx_ref[...])                                             # f32 [Np, Hp]
    ec_b = ec.astype(jnp.bfloat16)
    head_ref[...] = (jnp.dot(ec_b, wpeh_ref[...], preferred_element_type=jnp.float32)
                     + bpeh_ref[...])
    tail_ref[...] = (jnp.dot(ec_b, wpet_ref[...], preferred_element_type=jnp.float32)
                     + bpet_ref[...])


def context_and_post_emb(roi, wobj, bobj, wctx, bctx, wpeh, bpeh, wpet, bpet):
    n, c = roi.shape
    obj_pad = wobj.shape[1]
    h_pad = wctx.shape[1]
    args = (roi, wobj, bobj, wctx, bctx, wpeh, bpeh, wpet, bpet)

    def fs(shape):
        return pl.BlockSpec(shape, lambda i: (0, 0))

    flops = 2 * n * c * (obj_pad + h_pad) + 2 * 2 * n * h_pad * h_pad
    bytes_accessed = sum(int(a.size) * a.dtype.itemsize for a in args)
    bytes_accessed += 4 * n * (obj_pad + 2 * h_pad)

    return pl.pallas_call(
        _context_kernel,
        out_shape=(jax.ShapeDtypeStruct((n, obj_pad), jnp.float32),
                   jax.ShapeDtypeStruct((n, h_pad), jnp.float32),
                   jax.ShapeDtypeStruct((n, h_pad), jnp.float32)),
        grid=(1,),
        in_specs=[fs(a.shape) for a in args],
        out_specs=(fs((n, obj_pad)), fs((n, h_pad)), fs((n, h_pad))),
        compiler_params=pltpu.CompilerParams(dimension_semantics=("arbitrary",)),
        cost_estimate=pl.CostEstimate(flops=flops, transcendentals=n * h_pad,
                                      bytes_accessed=bytes_accessed),
    )(*args)


# ----------------------------------------------------------------------------
# Kernel B: relation predictor, tiled over N_rel with scalar-prefetch index gathers
#   gather(head, tail, freq rows) -> post_cat -> rel_compress -> + freq bias
# ----------------------------------------------------------------------------
def _relation_kernel(idx0_ref, idx1_ref, lbl_ref,              # SMEM scalar prefetch
                     head_ref, tail_ref, freq_ref,
                     wpch_ref, wpct_ref, bpc_ref, wrc_ref, brc_ref,
                     rel_ref,
                     gh_ref, gt_ref, fb_ref):
    tile_r = rel_ref.shape[0]
    r_base = pl.program_id(0) * tile_r

    # Index-based row gather (replaces one-hot @ table matmuls).
    def gather_row(r, carry):
        i0 = idx0_ref[r_base + r]
        i1 = idx1_ref[r_base + r]
        lb = lbl_ref[r_base + r]
        gh_ref[pl.ds(r, 1), :] = head_ref[pl.ds(i0, 1), :]
        gt_ref[pl.ds(r, 1), :] = tail_ref[pl.ds(i1, 1), :]
        fb_ref[pl.ds(r, 1), :] = freq_ref[pl.ds(lb, 1), :]
        return carry

    lax.fori_loop(0, tile_r, gather_row, 0)

    gh = gh_ref[...].astype(jnp.bfloat16)
    gt = gt_ref[...].astype(jnp.bfloat16)

    # post_cat: concat([gh, gt]) @ Wpc == gh @ Wpc_head + gt @ Wpc_tail
    prod = (jnp.dot(gh, wpch_ref[...], preferred_element_type=jnp.float32)
            + jnp.dot(gt, wpct_ref[...], preferred_element_type=jnp.float32)
            + bpc_ref[...])

    # rel_compress + FrequencyBias lookup
    rel = (jnp.dot(prod.astype(jnp.bfloat16), wrc_ref[...],
                   preferred_element_type=jnp.float32)
           + brc_ref[...])
    rel_ref[...] = rel + fb_ref[...]


def relation_predictor(idx0, idx1, pair_label, head, tail, freq,
                       wpch, wpct, bpc, wrc, brc, *, tile_r):
    n_rel_pad = idx0.shape[0]
    h_pad = head.shape[1]
    p_pad = wpch.shape[1]
    rel_pad = wrc.shape[1]
    num_tiles = n_rel_pad // tile_r

    tensor_args = (head, tail, freq, wpch, wpct, bpc, wrc, brc)

    gs = pltpu.PrefetchScalarGridSpec(
        num_scalar_prefetch=3,
        grid=(num_tiles,),
        in_specs=[pl.BlockSpec(a.shape, lambda i, *_: (0, 0)) for a in tensor_args],
        out_specs=pl.BlockSpec((tile_r, rel_pad), lambda i, *_: (i, 0)),
        scratch_shapes=[pltpu.VMEM((tile_r, h_pad), jnp.float32),
                        pltpu.VMEM((tile_r, h_pad), jnp.float32),
                        pltpu.VMEM((tile_r, rel_pad), jnp.float32)],
    )

    flops = 2 * n_rel_pad * (2 * h_pad * p_pad + p_pad * rel_pad)
    bytes_accessed = (sum(int(a.size) * a.dtype.itemsize for a in tensor_args)
                      + 3 * 4 * n_rel_pad + 4 * n_rel_pad * rel_pad)

    return pl.pallas_call(
        _relation_kernel,
        out_shape=jax.ShapeDtypeStruct((n_rel_pad, rel_pad), jnp.float32),
        grid_spec=gs,
        compiler_params=pltpu.CompilerParams(dimension_semantics=("parallel",)),
        cost_estimate=pl.CostEstimate(flops=flops, transcendentals=0,
                                      bytes_accessed=bytes_accessed),
    )(idx0, idx1, pair_label, *tensor_args)


# ----------------------------------------------------------------------------
# Python wrapper reproducing MotifPredictor.forward glue
# ----------------------------------------------------------------------------
def motif_predictor_forward(roi_features, rel_pair_idxs, num_objs, params,
                            num_obj_cls, num_rel_cls, tile_r=8):
    n_obj, c = roi_features.shape
    c_pad = _round_up(c, LANE)
    n_obj_pad = _round_up(n_obj, 16)

    roi_p = _pad2d(roi_features, n_obj_pad, c_pad).astype(jnp.bfloat16)

    # ---- kernel A: context stub + post_emb (fused) ----
    obj_dists_p, head, tail = context_and_post_emb(
        roi_p, params["wobj"], params["bobj"], params["wctx"], params["bctx"],
        params["wpe_head"], params["bpe_head"], params["wpe_tail"], params["bpe_tail"])

    obj_dists = obj_dists_p[:n_obj, :num_obj_cls]
    obj_preds = jnp.argmax(obj_dists, axis=-1).astype(jnp.int32)
    obj_id_this_batch = jnp.arange(n_obj, dtype=jnp.int32)

    # ---- pack per-image pair indices into one global int32 array (glue) ----
    num_rels = [int(p.shape[0]) for p in rel_pair_idxs]
    offsets, off = [], 0
    for n in num_objs:
        offsets.append(off)
        off += n
    pair_idx_all = jnp.concatenate(
        [p.astype(jnp.int32) + jnp.int32(o) for p, o in zip(rel_pair_idxs, offsets)],
        axis=0)
    n_rel = pair_idx_all.shape[0]
    g0 = pair_idx_all[:, 0]
    g1 = pair_idx_all[:, 1]
    pair_label = obj_preds[g0] * jnp.int32(num_obj_cls) + obj_preds[g1]

    n_rel_pad = _round_up(max(n_rel, tile_r), tile_r)
    pad_r = n_rel_pad - n_rel
    g0_p = jnp.pad(g0, (0, pad_r))
    g1_p = jnp.pad(g1, (0, pad_r))
    lbl_p = jnp.pad(pair_label, (0, pad_r))

    # ---- kernel B: relation predictor ----
    rel_dists_p = relation_predictor(
        g0_p, g1_p, lbl_p, head, tail, params["freq_table"],
        params["wpc_head"], params["wpc_tail"], params["bpc"],
        params["wrc"], params["brc"], tile_r=tile_r)
    rel_dists = rel_dists_p[:n_rel, :num_rel_cls]

    # per-image splits (API glue, static shapes)
    obj_dists_split, rel_dists_split, obj_id_split = [], [], []
    oo, ro = 0, 0
    for n_o, n_r in zip(num_objs, num_rels):
        obj_dists_split.append(obj_dists[oo:oo + n_o])
        obj_id_split.append(obj_id_this_batch[oo:oo + n_o])
        rel_dists_split.append(rel_dists[ro:ro + n_r])
        oo += n_o
        ro += n_r

    add_losses = {}
    return obj_dists_split, rel_dists_split, add_losses, rel_pair_idxs, obj_id_split


# ----------------------------------------------------------------------------
# Deterministic synthetic parameters / inputs + pure-JAX reference check
# ----------------------------------------------------------------------------
if __name__ == "__main__":
    key = jax.random.PRNGKey(0)

    C, H, P = 64, 32, 64            # obj feat channels, CONTEXT_HIDDEN_DIM, POOLING_DIM
    NUM_OBJ_CLS, NUM_REL_CLS = 8, 16
    num_objs = [5, 7]
    num_rels = [6, 10]
    TILE_R = 8

    C_PAD = _round_up(C, LANE)
    H_PAD = _round_up(H, LANE)
    P_PAD = _round_up(P, LANE)
    OBJ_PAD = _round_up(NUM_OBJ_CLS, LANE)
    REL_PAD = _round_up(NUM_REL_CLS, LANE)

    def xavier(k, shape):
        std = (2.0 / (shape[0] + shape[1])) ** 0.5
        return std * jax.random.normal(k, shape, dtype=jnp.float32)

    ks = jax.random.split(key, 12)
    wobj = xavier(ks[0], (C, NUM_OBJ_CLS))
    wctx = xavier(ks[1], (C, H))
    wpe = (10.0 * (1.0 / H) ** 0.5) * jax.random.normal(ks[2], (H, 2 * H), dtype=jnp.float32)
    wpc = xavier(ks[3], (2 * H, P))
    wrc = xavier(ks[4], (P, NUM_REL_CLS))
    freq = 0.1 * jax.random.normal(
        ks[5], (NUM_OBJ_CLS * NUM_OBJ_CLS, NUM_REL_CLS), dtype=jnp.float32)

    params = {
        "wobj": _pad2d(wobj, C_PAD, OBJ_PAD).astype(jnp.bfloat16),
        "bobj": jnp.zeros((1, OBJ_PAD), jnp.float32),
        "wctx": _pad2d(wctx, C_PAD, H_PAD).astype(jnp.bfloat16),
        "bctx": jnp.zeros((1, H_PAD), jnp.float32),
        "wpe_head": _pad2d(wpe[:, :H], H_PAD, H_PAD).astype(jnp.bfloat16),
        "bpe_head": jnp.zeros((1, H_PAD), jnp.float32),
        "wpe_tail": _pad2d(wpe[:, H:], H_PAD, H_PAD).astype(jnp.bfloat16),
        "bpe_tail": jnp.zeros((1, H_PAD), jnp.float32),
        "wpc_head": _pad2d(wpc[:H, :], H_PAD, P_PAD).astype(jnp.bfloat16),
        "wpc_tail": _pad2d(wpc[H:, :], H_PAD, P_PAD).astype(jnp.bfloat16),
        "bpc": jnp.zeros((1, P_PAD), jnp.float32),
        "wrc": _pad2d(wrc, P_PAD, REL_PAD).astype(jnp.bfloat16),
        "brc": jnp.zeros((1, REL_PAD), jnp.float32),
        "freq_table": _pad2d(freq, _round_up(NUM_OBJ_CLS * NUM_OBJ_CLS, 8), REL_PAD),
    }

    roi_features = jax.random.normal(ks[6], (sum(num_objs), C), dtype=jnp.float32)
    rel_pair_idxs = [
        jax.random.randint(ks[7], (num_rels[0], 2), 0, num_objs[0], dtype=jnp.int32),
        jax.random.randint(ks[8], (num_rels[1], 2), 0, num_objs[1], dtype=jnp.int32),
    ]

    outs = motif_predictor_forward(roi_features, rel_pair_idxs, num_objs, params,
                                   NUM_OBJ_CLS, NUM_REL_CLS, tile_r=TILE_R)
    obj_dists_split, rel_dists_split, add_losses, _, obj_ids = outs
    jax.block_until_ready(obj_dists_split[0])
    jax.block_until_ready(rel_dists_split[0])
    jax.block_until_ready(rel_dists_split[1])

    assert obj_dists_split[0].shape == (num_objs[0], NUM_OBJ_CLS)
    assert obj_dists_split[1].shape == (num_objs[1], NUM_OBJ_CLS)
    assert rel_dists_split[0].shape == (num_rels[0], NUM_REL_CLS)
    assert rel_dists_split[1].shape == (num_rels[1], NUM_REL_CLS)

    # ---- pure-JAX reference (same padded bf16 params) ----
    roi_p = _pad2d(roi_features, _round_up(sum(num_objs), 16), C_PAD).astype(jnp.bfloat16)
    obj_r = jnp.dot(roi_p, params["wobj"], preferred_element_type=jnp.float32) + params["bobj"]
    ec = jnp.tanh(jnp.dot(roi_p, params["wctx"], preferred_element_type=jnp.float32)
                  + params["bctx"]).astype(jnp.bfloat16)
    head_r = jnp.dot(ec, params["wpe_head"], preferred_element_type=jnp.float32) + params["bpe_head"]
    tail_r = jnp.dot(ec, params["wpe_tail"], preferred_element_type=jnp.float32) + params["bpe_tail"]
    obj_r = obj_r[:sum(num_objs), :NUM_OBJ_CLS]
    preds_r = jnp.argmax(obj_r, axis=-1).astype(jnp.int32)
    offs = [0, num_objs[0]]
    g0 = jnp.concatenate([rel_pair_idxs[i][:, 0] + offs[i] for i in range(2)])
    g1 = jnp.concatenate([rel_pair_idxs[i][:, 1] + offs[i] for i in range(2)])
    gh = head_r[g0].astype(jnp.bfloat16)
    gt = tail_r[g1].astype(jnp.bfloat16)
    prod_r = (jnp.dot(gh, params["wpc_head"], preferred_element_type=jnp.float32)
              + jnp.dot(gt, params["wpc_tail"], preferred_element_type=jnp.float32)
              + params["bpc"])
    rel_r = (jnp.dot(prod_r.astype(jnp.bfloat16), params["wrc"],
                     preferred_element_type=jnp.float32) + params["brc"])
    rel_r = rel_r + params["freq_table"][preds_r[g0] * NUM_OBJ_CLS + preds_r[g1]]
    rel_r = rel_r[:, :NUM_REL_CLS]

    obj_cat = jnp.concatenate(obj_dists_split, axis=0)
    rel_cat = jnp.concatenate(rel_dists_split, axis=0)
    assert bool(jnp.allclose(obj_cat, obj_r, atol=1e-1, rtol=1e-1))
    assert bool(jnp.allclose(rel_cat, rel_r, atol=1e-1, rtol=1e-1))

    print("KERNEL_OK")
</pallas_src>

<mosaic_0001>
module attributes {stable_mosaic.version = 11 : i64} {
  func.func @_context_kernel(%arg0: i32, %arg1: memref<16x128xbf16, #tpu.memory_space<vmem>>, %arg2: memref<128x128xbf16, #tpu.memory_space<vmem>>, %arg3: memref<1x128xf32, #tpu.memory_space<vmem>>, %arg4: memref<128x128xbf16, #tpu.memory_space<vmem>>, %arg5: memref<1x128xf32, #tpu.memory_space<vmem>>, %arg6: memref<128x128xbf16, #tpu.memory_space<vmem>>, %arg7: memref<1x128xf32, #tpu.memory_space<vmem>>, %arg8: memref<128x128xbf16, #tpu.memory_space<vmem>>, %arg9: memref<1x128xf32, #tpu.memory_space<vmem>>, %arg10: memref<16x128xf32, #tpu.memory_space<vmem>>, %arg11: memref<16x128xf32, #tpu.memory_space<vmem>>, %arg12: memref<16x128xf32, #tpu.memory_space<vmem>>) attributes {dimension_semantics = [#tpu.dimension_semantics<arbitrary>], iteration_bounds = array<i64: 1>, scalar_prefetch = 0 : i64, scratch_operands = 0 : i64, tpu.core_type = #tpu.core_type<tc>, window_params = [{pipeline_mode = #tpu.pipeline_mode<synchronous>, transform_indices = @transform_0, window_bounds = array<i64: 16, 128>}, {pipeline_mode = #tpu.pipeline_mode<synchronous>, transform_indices = @transform_1, window_bounds = array<i64: 128, 128>}, {pipeline_mode = #tpu.pipeline_mode<synchronous>, transform_indices = @transform_2, window_bounds = array<i64: 1, 128>}, {pipeline_mode = #tpu.pipeline_mode<synchronous>, transform_indices = @transform_3, window_bounds = array<i64: 128, 128>}, {pipeline_mode = #tpu.pipeline_mode<synchronous>, transform_indices = @transform_4, window_bounds = array<i64: 1, 128>}, {pipeline_mode = #tpu.pipeline_mode<synchronous>, transform_indices = @transform_5, window_bounds = array<i64: 128, 128>}, {pipeline_mode = #tpu.pipeline_mode<synchronous>, transform_indices = @transform_6, window_bounds = array<i64: 1, 128>}, {pipeline_mode = #tpu.pipeline_mode<synchronous>, transform_indices = @transform_7, window_bounds = array<i64: 128, 128>}, {pipeline_mode = #tpu.pipeline_mode<synchronous>, transform_indices = @transform_8, window_bounds = array<i64: 1, 128>}, {pipeline_mode = #tpu.pipeline_mode<synchronous>, transform_indices = @transform_9, window_bounds = array<i64: 16, 128>}, {pipeline_mode = #tpu.pipeline_mode<synchronous>, transform_indices = @transform_10, window_bounds = array<i64: 16, 128>}, {pipeline_mode = #tpu.pipeline_mode<synchronous>, transform_indices = @transform_11, window_bounds = array<i64: 16, 128>}]} {
    %c0 = arith.constant 0 : index
    %c0_0 = arith.constant 0 : index
    %0 = vector.load %arg1[%c0, %c0_0] : memref<16x128xbf16, #tpu.memory_space<vmem>>, vector<16x128xbf16>
    %c0_1 = arith.constant 0 : index
    %c0_2 = arith.constant 0 : index
    %1 = vector.load %arg2[%c0_1, %c0_2] : memref<128x128xbf16, #tpu.memory_space<vmem>>, vector<128x128xbf16>
    %cst = arith.constant dense<0.000000e+00> : vector<16x128xf32>
    %2 = tpu.matmul %0, %1, %cst {dimension_numbers = #tpu.dot_dimension_numbers<[1], [0], [0], [1], [0, 0, 1, 1], [], []>} : vector<16x128xbf16>, vector<128x128xbf16>, vector<16x128xf32> -> vector<16x128xf32>
    %c0_3 = arith.constant 0 : index
    %c0_4 = arith.constant 0 : index
    %3 = vector.load %arg3[%c0_3, %c0_4] : memref<1x128xf32, #tpu.memory_space<vmem>>, vector<1x128xf32>
    %4 = vector.broadcast %3 : vector<1x128xf32> to vector<16x128xf32>
    %5 = arith.addf %2, %4 : vector<16x128xf32>
    %c0_5 = arith.constant 0 : index
    %c0_6 = arith.constant 0 : index
    %6 = vector.load %arg10[%c0_5, %c0_6] : memref<16x128xf32, #tpu.memory_space<vmem>>, vector<16x128xf32>
    tpu.vector_store %arg10[%c0_5, %c0_6], %5 {strides = array<i32>} : memref<16x128xf32, #tpu.memory_space<vmem>>, vector<16x128xf32>,
    %c0_7 = arith.constant 0 : index
    %c0_8 = arith.constant 0 : index
    %7 = vector.load %arg4[%c0_7, %c0_8] : memref<128x128xbf16, #tpu.memory_space<vmem>>, vector<128x128xbf16>
    %cst_9 = arith.constant dense<0.000000e+00> : vector<16x128xf32>
    %8 = tpu.matmul %0, %7, %cst_9 {dimension_numbers = #tpu.dot_dimension_numbers<[1], [0], [0], [1], [0, 0, 1, 1], [], []>} : vector<16x128xbf16>, vector<128x128xbf16>, vector<16x128xf32> -> vector<16x128xf32>
    %c0_10 = arith.constant 0 : index
    %c0_11 = arith.constant 0 : index
    %9 = vector.load %arg5[%c0_10, %c0_11] : memref<1x128xf32, #tpu.memory_space<vmem>>, vector<1x128xf32>
    %10 = vector.broadcast %9 : vector<1x128xf32> to vector<16x128xf32>
    %11 = arith.addf %8, %10 : vector<16x128xf32>
    %12 = math.tanh %11 : vector<16x128xf32>
    %13 = arith.truncf %12 : vector<16x128xf32> to vector<16x128xbf16>
    %c0_12 = arith.constant 0 : index
    %c0_13 = arith.constant 0 : index
    %14 = vector.load %arg6[%c0_12, %c0_13] : memref<128x128xbf16, #tpu.memory_space<vmem>>, vector<128x128xbf16>
    %cst_14 = arith.constant dense<0.000000e+00> : vector<16x128xf32>
    %15 = tpu.matmul %13, %14, %cst_14 {dimension_numbers = #tpu.dot_dimension_numbers<[1], [0], [0], [1], [0, 0, 1, 1], [], []>} : vector<16x128xbf16>, vector<128x128xbf16>, vector<16x128xf32> -> vector<16x128xf32>
    %c0_15 = arith.constant 0 : index
    %c0_16 = arith.constant 0 : index
    %16 = vector.load %arg7[%c0_15, %c0_16] : memref<1x128xf32, #tpu.memory_space<vmem>>, vector<1x128xf32>
    %17 = vector.broadcast %16 : vector<1x128xf32> to vector<16x128xf32>
    %18 = arith.addf %15, %17 : vector<16x128xf32>
    %c0_17 = arith.constant 0 : index
    %c0_18 = arith.constant 0 : index
    %19 = vector.load %arg11[%c0_17, %c0_18] : memref<16x128xf32, #tpu.memory_space<vmem>>, vector<16x128xf32>
    tpu.vector_store %arg11[%c0_17, %c0_18], %18 {strides = array<i32>} : memref<16x128xf32, #tpu.memory_space<vmem>>, vector<16x128xf32>,
    %c0_19 = arith.constant 0 : index
    %c0_20 = arith.constant 0 : index
    %20 = vector.load %arg8[%c0_19, %c0_20] : memref<128x128xbf16, #tpu.memory_space<vmem>>, vector<128x128xbf16>
    %cst_21 = arith.constant dense<0.000000e+00> : vector<16x128xf32>
    %21 = tpu.matmul %13, %20, %cst_21 {dimension_numbers = #tpu.dot_dimension_numbers<[1], [0], [0], [1], [0, 0, 1, 1], [], []>} : vector<16x128xbf16>, vector<128x128xbf16>, vector<16x128xf32> -> vector<16x128xf32>
    %c0_22 = arith.constant 0 : index
    %c0_23 = arith.constant 0 : index
    %22 = vector.load %arg9[%c0_22, %c0_23] : memref<1x128xf32, #tpu.memory_space<vmem>>, vector<1x128xf32>
    %23 = vector.broadcast %22 : vector<1x128xf32> to vector<16x128xf32>
    %24 = arith.addf %21, %23 : vector<16x128xf32>
    %c0_24 = arith.constant 0 : index
    %c0_25 = arith.constant 0 : index
    %25 = vector.load %arg12[%c0_24, %c0_25] : memref<16x128xf32, #tpu.memory_space<vmem>>, vector<16x128xf32>
    tpu.vector_store %arg12[%c0_24, %c0_25], %24 {strides = array<i32>} : memref<16x128xf32, #tpu.memory_space<vmem>>, vector<16x128xf32>,
    return
  }
  func.func @transform_0(%arg0: i32) -> (i32, i32) {
    %c0_i32 = arith.constant 0 : i32
    %c0_i32_0 = arith.constant 0 : i32
    %c0_i32_1 = arith.constant 0 : i32
    return %c0_i32, %c0_i32_0 : i32, i32
  }
  func.func @transform_1(%arg0: i32) -> (i32, i32) {
    %c0_i32 = arith.constant 0 : i32
    %c0_i32_0 = arith.constant 0 : i32
    %c0_i32_1 = arith.constant 0 : i32
    return %c0_i32, %c0_i32_0 : i32, i32
  }
  func.func @transform_2(%arg0: i32) -> (i32, i32) {
    %c0_i32 = arith.constant 0 : i32
    %c0_i32_0 = arith.constant 0 : i32
    %c0_i32_1 = arith.constant 0 : i32
    return %c0_i32, %c0_i32_0 : i32, i32
  }
  func.func @transform_3(%arg0: i32) -> (i32, i32) {
    %c0_i32 = arith.constant 0 : i32
    %c0_i32_0 = arith.constant 0 : i32
    %c0_i32_1 = arith.constant 0 : i32
    return %c0_i32, %c0_i32_0 : i32, i32
  }
  func.func @transform_4(%arg0: i32) -> (i32, i32) {
    %c0_i32 = arith.constant 0 : i32
    %c0_i32_0 = arith.constant 0 : i32
    %c0_i32_1 = arith.constant 0 : i32
    return %c0_i32, %c0_i32_0 : i32, i32
  }
  func.func @transform_5(%arg0: i32) -> (i32, i32) {
    %c0_i32 = arith.constant 0 : i32
    %c0_i32_0 = arith.constant 0 : i32
    %c0_i32_1 = arith.constant 0 : i32
    return %c0_i32, %c0_i32_0 : i32, i32
  }
  func.func @transform_6(%arg0: i32) -> (i32, i32) {
    %c0_i32 = arith.constant 0 : i32
    %c0_i32_0 = arith.constant 0 : i32
    %c0_i32_1 = arith.constant 0 : i32
    return %c0_i32, %c0_i32_0 : i32, i32
  }
  func.func @transform_7(%arg0: i32) -> (i32, i32) {
    %c0_i32 = arith.constant 0 : i32
    %c0_i32_0 = arith.constant 0 : i32
    %c0_i32_1 = arith.constant 0 : i32
    return %c0_i32, %c0_i32_0 : i32, i32
  }
  func.func @transform_8(%arg0: i32) -> (i32, i32) {
    %c0_i32 = arith.constant 0 : i32
    %c0_i32_0 = arith.constant 0 : i32
    %c0_i32_1 = arith.constant 0 : i32
    return %c0_i32, %c0_i32_0 : i32, i32
  }
  func.func @transform_9(%arg0: i32) -> (i32, i32) {
    %c0_i32 = arith.constant 0 : i32
    %c0_i32_0 = arith.constant 0 : i32
    %c0_i32_1 = arith.constant 0 : i32
    return %c0_i32, %c0_i32_0 : i32, i32
  }
  func.func @transform_10(%arg0: i32) -> (i32, i32) {
    %c0_i32 = arith.constant 0 : i32
    %c0_i32_0 = arith.constant 0 : i32
    %c0_i32_1 = arith.constant 0 : i32
    return %c0_i32, %c0_i32_0 : i32, i32
  }
  func.func @transform_11(%arg0: i32) -> (i32, i32) {
    %c0_i32 = arith.constant 0 : i32
    %c0_i32_0 = arith.constant 0 : i32
    %c0_i32_1 = arith.constant 0 : i32
    return %c0_i32, %c0_i32_0 : i32, i32
  }
}

</mosaic_0001>

<bundles_post_ra>
// kernel: tpu_custom_call.1
= control target key start
LH: loop header
LB: loop body
LE: loop exit
PB: predicated region body
PF: predicated region fallthrough
CT: control target
= control target key end

     0   :  { %17 = vsyncpa [#allocation3], 0  ;;  %s1020_s0 = inlined_call_operand.hbm [shape: bf16[16,128], index: 0, kind: input, shape index: {}]   ;;  %s1021_s1 = inlined_call_operand.hbm [shape: bf16[128,128], index: 1, kind: input, shape index: {}]   ;;  %s1022_s2 = inlined_call_operand.vmem [shape: f32[1,128], index: 2, kind: input, shape index: {}]   ;;  %s1023_s3 = inlined_call_operand.hbm [shape: bf16[128,128], index: 3, kind: input, shape index: {}]   ;;  %s1024_s4 = inlined_call_operand.vmem [shape: f32[1,128], index: 4, kind: input, shape index: {}]   ;;  %s1025_s5 = inlined_call_operand.hbm [shape: bf16[128,128], index: 5, kind: input, shape index: {}]   ;;  %s1026_s6 = inlined_call_operand.vmem [shape: f32[1,128], index: 6, kind: input, shape index: {}]   ;;  %s1027_s7 = inlined_call_operand.hbm [shape: bf16[128,128], index: 7, kind: input, shape index: {}]   ;;  %s1028_s8 = inlined_call_operand.vmem [shape: f32[1,128], index: 8, kind: input, shape index: {}]   ;;  %s1029_s9 = inlined_call_operand.hbm [shape: f32[16,128], index: 9, kind: output, shape index: {0}]   ;;  %s1030_s10 = inlined_call_operand.hbm [shape: f32[16,128], index: 10, kind: output, shape index: {1}]   ;;  %s1031_s11 = inlined_call_operand.hbm [shape: f32[16,128], index: 11, kind: output, shape index: {2}]  }
   0x1   :  { %18 = vsyncpa [#allocation6], 0 }
   0x2   :  { %19 = vsyncpa [#allocation9], 0 }
   0x3   :  { %20 = vsyncpa [#allocation4], 0 }
   0x4   :  { %21 = vsyncpa [#allocation13], 0  ;;  %s39_s19 = sshll.u32 %s1021_s1, 4  ;;  %s903_s20 = smov [#allocation5]   ;;  %s40_s19 = int_to_ptr.hbm [resolvable:$true] %s39_s19 }
   0x5   :  { %s41_s21 = sshll.u32 %s903_s20, 4  ;;  %s69_s24 = sshll.u32 %s1025_s5, 4  ;;  %s42_s21 = int_to_ptr.vmem [resolvable:$true] %s41_s21  ;;  %s70_s24 = int_to_ptr.hbm [resolvable:$true] %s69_s24 }
   0x6   :  { %s904_s25 = smov 64   ;;  %s905_s26 = smov 4  }
   0x7   :  { %47 = dma.hbm_to_vmem [thread:$0]  %s40_s19, 1024, %s42_s21, [#allocation6], %s904_s25, %s904_s25, %s905_s26  }
   0x8   :  { %s906_s27 = smov [#allocation8]   ;;  %s26_s12 = sshll.u32 %s1020_s0, 4  ;;  %s27_s12 = int_to_ptr.hbm [resolvable:$true] %s26_s12 }
   0x9   :  { %s71_s28 = sshll.u32 %s906_s27, 4  ;;  %s54_s14 = sshll.u32 %s1023_s3, 4  ;;  %s72_s28 = int_to_ptr.vmem [resolvable:$true] %s71_s28  ;;  %s55_s14 = int_to_ptr.hbm [resolvable:$true] %s54_s14 }
   0xa   :  { %77 = dma.hbm_to_vmem [thread:$0]  %s70_s24, 1024, %s72_s28, [#allocation9], %s904_s25, %s904_s25, %s905_s26  }
   0xb   :  { %s907_s15 = smov [#allocation2]   ;;  %s908_s5 = smov [#allocation7]  }
   0xc   :  { %s28_s16 = sshll.u32 %s907_s15, 4  ;;  %s56_s17 = sshll.u32 %s908_s5, 4  ;;  %s29_s16 = int_to_ptr.vmem [resolvable:$true] %s28_s16  ;;  %s57_s17 = int_to_ptr.vmem [resolvable:$true] %s56_s17 }
   0xd   :  { %34 = dma.hbm_to_vmem [thread:$0]  %s27_s12, 128, %s29_s16, [#allocation3], %s904_s25, %s904_s25, %s905_s26  }
   0xe   :  { %s84_s20 = sshll.u32 %s1027_s7, 4  ;;  %s909_s0 = smov [#allocation10]   ;;  %s85_s20 = int_to_ptr.hbm [resolvable:$true] %s84_s20 }
   0xf   :  { %62 = dma.hbm_to_vmem [thread:$0]  %s55_s14, 1024, %s57_s17, [#allocation6], %s904_s25, %s904_s25, %s905_s26  }
  0x10   :  { %s86_s21 = sshll.u32 %s909_s0, 4  ;;  %s87_s21 = int_to_ptr.vmem [resolvable:$true] %s86_s21 }
  0x11   :  { %92 = dma.hbm_to_vmem [thread:$0]  %s85_s20, 1024, %s87_s21, [#allocation9], %s904_s25, %s904_s25, %s905_s26  }
  0x12   :  { %893 = dma.done.wait [#allocation3], 128  }
  0x13   :  { %894 = vsyncadd [#allocation3], 4294967168 }
  0x14   :  { %895 = dma.done.wait [#allocation6], 2048  }
  0x15   :  { %896 = vsyncadd [#allocation6], 4294965248 }
  0x16   :  { %897 = dma.done.wait [#allocation9], 2048  }
  0x17   :  { %898 = vsyncadd [#allocation9], 4294965248  ;;  %v664_v0 = vld [vmem:[#allocation7 + $0x38] sm:$0xff]  ;;  %v663_v1 = vld [vmem:[#allocation7 + $0x30] sm:$0xff]  ;;  %s910_s24 = smov [#allocation11]   ;;  %s466_s27 = sshll.u32 %s1029_s9, 4  ;;  %s467_s27 = int_to_ptr.hbm [resolvable:$true] %s466_s27 }
  0x18   :  { %275 = vmatpush.bf16.msra.mxu1 %v664_v0  ;;  %v656_v2 = vld [vmem:[#allocation5 + $0x38] sm:$0xff]  ;;  %v655_v5 = vld [vmem:[#allocation5 + $0x30] sm:$0xff]  ;;  %v662_v7 = vld [vmem:[#allocation7 + $0x28] sm:$0xff]  ;;  %s464_s25 = sshll.u32 %s910_s24, 4  ;;  %s911_s28 = smov 128   ;;  %s465_s25 = int_to_ptr.vmem [resolvable:$true] %s464_s25 }
  0x19   :  { %v672_v3 = vld [vmem:[#allocation8 + $0x38] sm:$0xff]  ;;  %191 = vmatpush.bf16.msra.mxu0 %v656_v2  ;;  %v671_v6 = vld [vmem:[#allocation8 + $0x30] sm:$0xff]  ;;  %v654_v9 = vld [vmem:[#allocation5 + $0x28] sm:$0xff]  ;;  %s912_s29 = smov 8   ;;  %s913_s9 = smov [#allocation12]  }
  0x1a   :  { %v680_v4 = vld [vmem:[#allocation10 + $0x38] sm:$0xff]  ;;  %360 = vmatpush.bf16.msra.mxu2 %v672_v3  ;;  %v679_v8 = vld [vmem:[#allocation10 + $0x30] sm:$0xff]  ;;  %v670_v10 = vld [vmem:[#allocation8 + $0x28] sm:$0xff]  ;;  %s477_s13 = sshll.u32 %s913_s9, 4  ;;  %s479_s16 = sshll.u32 %s1030_s10, 4  ;;  %s478_s13 = int_to_ptr.vmem [resolvable:$true] %s477_s13  ;;  %s480_s16 = int_to_ptr.hbm [resolvable:$true] %s479_s16 }
  0x1b   :  { %444 = vmatpush.bf16.msra.mxu3 %v680_v4  ;;  %v661_v11 = vld [vmem:[#allocation7 + $0x20] sm:$0xff]  ;;  %v678_v12 = vld [vmem:[#allocation10 + $0x28] sm:$0xff]  ;;  %v660_v14 = vld [vmem:[#allocation7 + $0x18] sm:$0xff]  ;;  %s914_s5 = smov [#allocation14]   ;;  %s492_s19 = sshll.u32 %s1031_s11, 4  ;;  %s493_s19 = int_to_ptr.hbm [resolvable:$true] %s492_s19 }
  0x1c   :  { %276 = vmatpush.bf16.msra.mxu1 %v663_v1  ;;  %v653_v13 = vld [vmem:[#allocation5 + $0x20] sm:$0xff]  ;;  %v659_v15 = vld [vmem:[#allocation7 + $0x10] sm:$0xff]  ;;  %v658_v16 = vld [vmem:[#allocation7 + $0x8] sm:$0xff]  ;;  %s490_s17 = sshll.u32 %s914_s5, 4  ;;  %s491_s17 = int_to_ptr.vmem [resolvable:$true] %s490_s17 }
  0x1d   :  { %192 = vmatpush.bf16.msra.mxu0 %v655_v5  ;;  %v657_v17 = vld [vmem:[#allocation7] sm:$0xff]  ;;  %v648_v18 = vld [vmem:[#allocation2] sm:$0xff]  ;;  %v651_v24 = vld [vmem:[#allocation5 + $0x10] sm:$0xff] }
  0x1e   :  { %361 = vmatpush.bf16.msra.mxu2 %v671_v6  ;;  %v669_v19 = vld [vmem:[#allocation8 + $0x20] sm:$0xff]  ;;  %v652_v21 = vld [vmem:[#allocation5 + $0x18] sm:$0xff]  ;;  %v667_v25 = vld [vmem:[#allocation8 + $0x10] sm:$0xff] }
  0x1f   :  { %445 = vmatpush.bf16.msra.mxu3 %v679_v8  ;;  %v677_v20 = vld [vmem:[#allocation10 + $0x20] sm:$0xff]  ;;  %v668_v22 = vld [vmem:[#allocation8 + $0x18] sm:$0xff]  ;;  %v675_v26 = vld [vmem:[#allocation10 + $0x10] sm:$0xff] }
  0x20   :  { %277 = vmatpush.bf16.msra.mxu1 %v662_v7  ;;  %v676_v23 = vld [vmem:[#allocation10 + $0x18] sm:$0xff]  ;;  %v650_v27 = vld [vmem:[#allocation5 + $0x8] sm:$0xff]  ;;  %v649_v30 = vld [vmem:[#allocation5] sm:$0xff] }
  0x21   :  { %193 = vmatpush.bf16.msra.mxu0 %v654_v9  ;;  %v666_v28 = vld [vmem:[#allocation8 + $0x8] sm:$0xff]  ;;  %v665_v31 = vld [vmem:[#allocation8] sm:$0xff]  ;;  %v693_v34 = vld [vmem:[%s1024_s4] ss:$0 sm:$0xff] }
  0x22   :  { %362 = vmatpush.bf16.msra.mxu2 %v670_v10  ;;  %v674_v29 = vld [vmem:[#allocation10 + $0x8] sm:$0xff]  ;;  %v673_v32 = vld [vmem:[#allocation10] sm:$0xff]  ;;  %v694_v41 = vld [vmem:[%s1022_s2] ss:$0 sm:$0xff] }
  0x23   :  { %446 = vmatpush.bf16.msra.mxu3 %v678_v12  ;;  %v695_v46 = vld [vmem:[%s1026_s6] ss:$0 sm:$0xff] }
  0x24   :  { %278 = vmatpush.bf16.msra.mxu1 %v661_v11  ;;  %v696_v47 = vld [vmem:[%s1028_s8] ss:$0 sm:$0xff] }
  0x25   :  { %194 = vmatpush.bf16.msra.mxu0 %v653_v13 }
  0x26   :  { %363 = vmatpush.bf16.msra.mxu2 %v669_v19 }
  0x27   :  { %447 = vmatpush.bf16.msra.mxu3 %v677_v20 }
  0x28   :  { %279 = vmatpush.bf16.msra.mxu1 %v660_v14 }
  0x29   :  { %195 = vmatpush.bf16.msra.mxu0 %v652_v21 }
  0x2a   :  { %364 = vmatpush.bf16.msra.mxu2 %v668_v22 }
  0x2b   :  { %448 = vmatpush.bf16.msra.mxu3 %v676_v23 }
  0x2c   :  { %280 = vmatpush.bf16.msra.mxu1 %v659_v15 }
  0x2d   :  { %196 = vmatpush.bf16.msra.mxu0 %v651_v24 }
  0x2e   :  { %365 = vmatpush.bf16.msra.mxu2 %v667_v25 }
  0x2f   :  { %449 = vmatpush.bf16.msra.mxu3 %v675_v26 }
  0x30   :  { %281 = vmatpush.bf16.msra.mxu1 %v658_v16 }
  0x31   :  { %197 = vmatpush.bf16.msra.mxu0 %v650_v27 }
  0x32   :  { %366 = vmatpush.bf16.msra.mxu2 %v666_v28 }
  0x33   :  { %450 = vmatpush.bf16.msra.mxu3 %v674_v29 }
  0x34   :  { %282 = vmatpush.bf16.msra.mxu1 %v657_v17 }
  0x35   :  { %198 = vmatpush.bf16.msra.mxu0 %v649_v30 }
  0x36   :  { %367 = vmatpush.bf16.msra.mxu2 %v665_v31 }
  0x37   :  { %283 = vmatmul.bf16.vlgmr.msra.gmra.mxu1 %v648_v18  ;;  %451 = vmatpush.bf16.msra.mxu3 %v673_v32 }
  0x38   :  { %199 = vmatmul.bf16.vlgmr.msra.gmra.mxu0 %v648_v18 }
  0xb4   :  { %v284_v33 = vpop.f32.mrf.mxu1 }
  0xb5   :  { %v285_v35 = vadd.f32 %v693_v34, %v284_v33  ;;  %v200_v42 = vpop.f32.mrf.mxu0 }
  0xb6   :  { %v201_v43 = vadd.f32 %v694_v41, %v200_v42 }
  0xb7   :  { %697 = vtanh.f32 %v285_v35 }
  0xb8   :  { %205 = vst [vmem:[#allocation11] sm:$0xff] %v201_v43 }
  0xbc   :  { %v286_v36 = vpop.f32.mrf.mxu1 }
  0xbd   :  { %v287_v37 = vadd.f32 %v693_v34, %v286_v36  ;;  %v698_v38 = vpop.eup %697  ;;  %v202_v44 = vpop.f32.mrf.mxu0 }
  0xbe   :  { %v203_v45 = vadd.f32 %v694_v41, %v202_v44 }
  0xbf   :  { %699 = vtanh.f32 %v287_v37 }
  0xc0   :  { %206 = vst [vmem:[#allocation11 + $0x8] sm:$0xff] %v203_v45 }
  0xc1   :  { %472 = dma.vmem_to_hbm [thread:$0]  %s465_s25, 256, %s467_s27, [#allocation4], %s911_s28, %s911_s28, %s912_s29  }
  0xc5   :  { %v700_v39 = vpop.eup %699 }
  0xc6   :  { %v291_v40 = vpack.c.bf16 %v700_v39, %v698_v38 }
  0xc8   :  { %368 = vmatmul.bf16.vlgmr.msra.gmra.mxu2 %v291_v40  ;;  %452 = vmatmul.bf16.vlgmr.msra.gmra.mxu3 %v291_v40 }
 0x14b   :  { %v369_v48 = vpop.f32.mrf.mxu2  ;;  %v453_v49 = vpop.f32.mrf.mxu3 }
 0x14c   :  { %v370_v50 = vadd.f32 %v695_v46, %v369_v48  ;;  %v454_v51 = vadd.f32 %v696_v47, %v453_v49 }
 0x14e   :  { %374 = vst [vmem:[#allocation12] sm:$0xff] %v370_v50 }
 0x14f   :  { %458 = vst [vmem:[#allocation14] sm:$0xff] %v454_v51 }
 0x153   :  { %v371_v52 = vpop.f32.mrf.mxu2  ;;  %v455_v53 = vpop.f32.mrf.mxu3 }
 0x154   :  { %v372_v54 = vadd.f32 %v695_v46, %v371_v52  ;;  %v456_v55 = vadd.f32 %v696_v47, %v455_v53 }
 0x156   :  { %375 = vst [vmem:[#allocation12 + $0x8] sm:$0xff] %v372_v54 }
 0x157   :  { %459 = vst [vmem:[#allocation14 + $0x8] sm:$0xff] %v456_v55  ;;  %485 = dma.vmem_to_hbm [thread:$0]  %s478_s13, 256, %s480_s16, [#allocation13], %s911_s28, %s911_s28, %s912_s29  }
 0x158   :  { %498 = dma.vmem_to_hbm [thread:$0]  %s491_s17, 256, %s493_s19, [#allocation13], %s911_s28, %s911_s28, %s912_s29  }
 0x159   :  { %899 = dma.done.wait [#allocation4], 256  }
 0x15a   :  { %900 = vsyncadd [#allocation4], 4294967040 }
 0x15b   :  { %901 = dma.done.wait [#allocation13], 512  }
 0x15c   :  { %902 = vsyncadd [#allocation13], 4294966784 }
 0x15d   :  { %511 = vsyncpa [#allocation3], 1 }
 0x15e   :  { %512 = vsyncpa [#allocation6], 1 }
 0x15f   :  { %513 = vsyncpa [#allocation9], 1 }
 0x160   :  { %514 = vsyncpa [#allocation4], 1 }
 0x161   :  { %515 = vsyncpa [#allocation13], 1 }

</bundles_post_ra>
